<compile_context>
chip_gen: v6e
topology: v6e:2x2x1
jax: 0.10.0
libtpu: 0.0.40
codegen_flags: <defaults>
</compile_context>

<pallas_src>
import jax
import jax.numpy as jnp
from jax.experimental import pallas as pl
from jax.experimental.pallas import tpu as pltpu


def _mol_predictor_kernel(x_ref, w_enc_ref, b_enc_ref, w_pred_ref, b_pred_ref, o_ref):
    # encoder: Linear + ReLU  (MXU matmul, f32 accumulate; bias+ReLU on VPU)
    h = jnp.dot(x_ref[...], w_enc_ref[...], preferred_element_type=jnp.float32)
    h = jnp.maximum(h + b_enc_ref[...], 0.0)
    # predictor: Linear(latent, n_pad) -- n_pad is a 128 multiple, so the
    # result tile is lane-dense and stores are unmasked full vregs.
    out = jnp.dot(h, w_pred_ref[...], preferred_element_type=jnp.float32)
    o_ref[...] = (out + b_pred_ref[...]).astype(o_ref.dtype)


def mol_predictor(mol, w_enc, b_enc, w_pred, b_pred, *, max_block_m=256):
    """mol: (B, in_dim); w_enc: (in_dim, latent); b_enc: (1, latent);
    w_pred: (latent, num_tasks); b_pred: (num_tasks,) or (1, num_tasks)."""
    B, in_dim = mol.shape
    latent = w_enc.shape[1]
    num_tasks = w_pred.shape[1]

    # --- lane-dense output: zero-pad the task dimension to a 128 multiple ---
    n_pad = pl.cdiv(max(num_tasks, 1), 128) * 128
    w_pred_p = jnp.zeros((latent, n_pad), w_pred.dtype).at[:, :num_tasks].set(w_pred)
    b_pred_p = (
        jnp.zeros((1, n_pad), jnp.float32)
        .at[:, :num_tasks]
        .set(b_pred.reshape(1, num_tasks).astype(jnp.float32))
    )

    # --- batch tiling: tile is a multiple of 8 sublanes, capped at 256 rows
    #     (fits comfortably in v7x's 64 MiB VMEM / 32 MiB scoped default) ---
    tm = min(max_block_m, ((B + 7) // 8) * 8)
    b_pad = pl.cdiv(B, tm) * tm
    if b_pad != B:
        mol = jnp.pad(mol, ((0, b_pad - B), (0, 0)))
    grid = (b_pad // tm,)

    flops = 2 * b_pad * (in_dim * latent + latent * n_pad)
    bytes_accessed = 4 * (
        b_pad * in_dim            # x
        + in_dim * latent + latent  # encoder weights + bias
        + latent * n_pad + n_pad    # predictor weights + bias (padded)
        + b_pad * n_pad             # output
    )

    out_p = pl.pallas_call(
        _mol_predictor_kernel,
        out_shape=jax.ShapeDtypeStruct((b_pad, n_pad), jnp.float32),
        grid=grid,
        in_specs=[
            # activations: tiled over batch
            pl.BlockSpec((tm, in_dim), lambda i: (i, 0)),
            # weights / biases: full-extent blocks, resident across the grid
            pl.BlockSpec((in_dim, latent), lambda i: (0, 0)),
            pl.BlockSpec((1, latent), lambda i: (0, 0)),
            pl.BlockSpec((latent, n_pad), lambda i: (0, 0)),
            pl.BlockSpec((1, n_pad), lambda i: (0, 0)),
        ],
        out_specs=pl.BlockSpec((tm, n_pad), lambda i: (i, 0)),
        compiler_params=pltpu.CompilerParams(
            dimension_semantics=("parallel",),
        ),
        cost_estimate=pl.CostEstimate(
            flops=flops, transcendentals=0, bytes_accessed=bytes_accessed
        ),
    )(mol, w_enc, b_enc, w_pred_p, b_pred_p)

    # Slice away batch padding and the zero-padded task columns.
    return out_p[:B, :num_tasks]


if __name__ == "__main__":
    # Small shapes consistent with the module: batch=8 molecules, 32 input
    # features, latent_dim=256 (module default), num_tasks=1.
    B, IN_DIM, LATENT_DIM, NUM_TASKS = 8, 32, 256, 1

    key = jax.random.PRNGKey(0)
    k_x, k_we, k_be, k_wp, k_bp = jax.random.split(key, 5)

    mol = jax.random.normal(k_x, (B, IN_DIM), dtype=jnp.float32)

    # Deterministic synthetic parameters (no checkpoint load).
    # Encoder Linear(IN_DIM, LATENT_DIM): stored pre-transposed as (in, out).
    w_enc = jax.random.normal(k_we, (IN_DIM, LATENT_DIM), dtype=jnp.float32) * 0.05
    b_enc = jax.random.normal(k_be, (1, LATENT_DIM), dtype=jnp.float32) * 0.01
    # Predictor nn.Linear(LATENT_DIM, NUM_TASKS): torch weight is (out, in);
    # pass transposed (in, out) so the kernel computes emb @ W^T.
    w_pred = jax.random.normal(k_wp, (LATENT_DIM, NUM_TASKS), dtype=jnp.float32) * 0.05
    b_pred = jax.random.normal(k_bp, (1, NUM_TASKS), dtype=jnp.float32) * 0.01

    out = mol_predictor(mol, w_enc, b_enc, w_pred, b_pred)
    out = jax.block_until_ready(out)

    # Pure-JAX reference check of the fused kernel (unpadded math).
    emb_ref = jnp.maximum(mol @ w_enc + b_enc, 0.0)
    out_ref = emb_ref @ w_pred + b_pred
    assert out.shape == (B, NUM_TASKS)
    assert jnp.allclose(out, out_ref, atol=1e-5, rtol=1e-5)

    print("KERNEL_OK")
</pallas_src>

<mosaic_0001>
module attributes {stable_mosaic.version = 11 : i64} {
  func.func @_mol_predictor_kernel(%arg0: i32, %arg1: memref<8x32xf32, #tpu.memory_space<vmem>>, %arg2: memref<32x256xf32, #tpu.memory_space<vmem>>, %arg3: memref<1x256xf32, #tpu.memory_space<vmem>>, %arg4: memref<256x128xf32, #tpu.memory_space<vmem>>, %arg5: memref<1x128xf32, #tpu.memory_space<vmem>>, %arg6: memref<8x128xf32, #tpu.memory_space<vmem>>) attributes {dimension_semantics = [#tpu.dimension_semantics<parallel>], iteration_bounds = array<i64: 1>, scalar_prefetch = 0 : i64, scratch_operands = 0 : i64, tpu.core_type = #tpu.core_type<tc>, window_params = [{transform_indices = @transform_0, window_bounds = array<i64: 8, 32>}, {pipeline_mode = #tpu.pipeline_mode<synchronous>, transform_indices = @transform_1, window_bounds = array<i64: 32, 256>}, {pipeline_mode = #tpu.pipeline_mode<synchronous>, transform_indices = @transform_2, window_bounds = array<i64: 1, 256>}, {pipeline_mode = #tpu.pipeline_mode<synchronous>, transform_indices = @transform_3, window_bounds = array<i64: 256, 128>}, {pipeline_mode = #tpu.pipeline_mode<synchronous>, transform_indices = @transform_4, window_bounds = array<i64: 1, 128>}, {transform_indices = @transform_5, window_bounds = array<i64: 8, 128>}]} {
    %c0 = arith.constant 0 : index
    %c0_0 = arith.constant 0 : index
    %0 = vector.load %arg1[%c0, %c0_0] : memref<8x32xf32, #tpu.memory_space<vmem>>, vector<8x32xf32>
    %c0_1 = arith.constant 0 : index
    %c0_2 = arith.constant 0 : index
    %1 = vector.load %arg2[%c0_1, %c0_2] : memref<32x256xf32, #tpu.memory_space<vmem>>, vector<32x256xf32>
    %cst = arith.constant dense<0.000000e+00> : vector<8x256xf32>
    %2 = tpu.matmul %0, %1, %cst {dimension_numbers = #tpu.dot_dimension_numbers<[1], [0], [0], [1], [0, 0, 1, 1], [], []>} : vector<8x32xf32>, vector<32x256xf32>, vector<8x256xf32> -> vector<8x256xf32>
    %c0_3 = arith.constant 0 : index
    %c0_4 = arith.constant 0 : index
    %3 = vector.load %arg3[%c0_3, %c0_4] : memref<1x256xf32, #tpu.memory_space<vmem>>, vector<1x256xf32>
    %4 = vector.broadcast %3 : vector<1x256xf32> to vector<8x256xf32>
    %5 = arith.addf %2, %4 : vector<8x256xf32>
    %cst_5 = arith.constant 0.000000e+00 : f32
    %6 = vector.broadcast %cst_5 : f32 to vector<8x256xf32>
    %7 = arith.maximumf %5, %6 : vector<8x256xf32>
    %c0_6 = arith.constant 0 : index
    %c0_7 = arith.constant 0 : index
    %8 = vector.load %arg4[%c0_6, %c0_7] : memref<256x128xf32, #tpu.memory_space<vmem>>, vector<256x128xf32>
    %cst_8 = arith.constant dense<0.000000e+00> : vector<8x128xf32>
    %9 = tpu.matmul %7, %8, %cst_8 {dimension_numbers = #tpu.dot_dimension_numbers<[1], [0], [0], [1], [0, 0, 1, 1], [], []>} : vector<8x256xf32>, vector<256x128xf32>, vector<8x128xf32> -> vector<8x128xf32>
    %c0_9 = arith.constant 0 : index
    %c0_10 = arith.constant 0 : index
    %10 = vector.load %arg5[%c0_9, %c0_10] : memref<1x128xf32, #tpu.memory_space<vmem>>, vector<1x128xf32>
    %11 = vector.broadcast %10 : vector<1x128xf32> to vector<8x128xf32>
    %12 = arith.addf %9, %11 : vector<8x128xf32>
    %c0_11 = arith.constant 0 : index
    %c0_12 = arith.constant 0 : index
    %13 = vector.load %arg6[%c0_11, %c0_12] : memref<8x128xf32, #tpu.memory_space<vmem>>, vector<8x128xf32>
    tpu.vector_store %arg6[%c0_11, %c0_12], %12 {strides = array<i32>} : memref<8x128xf32, #tpu.memory_space<vmem>>, vector<8x128xf32>,
    return
  }
  func.func @transform_0(%arg0: i32) -> (i32, i32) {
    %c0_i32 = arith.constant 0 : i32
    %c0_i32_0 = arith.constant 0 : i32
    return %arg0, %c0_i32 : i32, i32
  }
  func.func @transform_1(%arg0: i32) -> (i32, i32) {
    %c0_i32 = arith.constant 0 : i32
    %c0_i32_0 = arith.constant 0 : i32
    %c0_i32_1 = arith.constant 0 : i32
    return %c0_i32, %c0_i32_0 : i32, i32
  }
  func.func @transform_2(%arg0: i32) -> (i32, i32) {
    %c0_i32 = arith.constant 0 : i32
    %c0_i32_0 = arith.constant 0 : i32
    %c0_i32_1 = arith.constant 0 : i32
    return %c0_i32, %c0_i32_0 : i32, i32
  }
  func.func @transform_3(%arg0: i32) -> (i32, i32) {
    %c0_i32 = arith.constant 0 : i32
    %c0_i32_0 = arith.constant 0 : i32
    %c0_i32_1 = arith.constant 0 : i32
    return %c0_i32, %c0_i32_0 : i32, i32
  }
  func.func @transform_4(%arg0: i32) -> (i32, i32) {
    %c0_i32 = arith.constant 0 : i32
    %c0_i32_0 = arith.constant 0 : i32
    %c0_i32_1 = arith.constant 0 : i32
    return %c0_i32, %c0_i32_0 : i32, i32
  }
  func.func @transform_5(%arg0: i32) -> (i32, i32) {
    %c0_i32 = arith.constant 0 : i32
    %c0_i32_0 = arith.constant 0 : i32
    return %arg0, %c0_i32 : i32, i32
  }
}

</mosaic_0001>

<bundles_post_ra>
// kernel: tpu_custom_call.1
= control target key start
LH: loop header
LB: loop body
LE: loop exit
PB: predicated region body
PF: predicated region fallthrough
CT: control target
= control target key end

     0   :  { %10 = vsyncpa [#allocation3], 0  ;;  %s473_s0 = inlined_call_operand.hbm [shape: f32[8,32], index: 0, kind: input, shape index: {}]   ;;  %s474_s1 = inlined_call_operand.hbm [shape: f32[32,256], index: 1, kind: input, shape index: {}]   ;;  %s475_s2 = inlined_call_operand.vmem [shape: f32[1,256], index: 2, kind: input, shape index: {}]   ;;  %s476_s3 = inlined_call_operand.hbm [shape: f32[256,128], index: 3, kind: input, shape index: {}]   ;;  %s477_s4 = inlined_call_operand.vmem [shape: f32[1,128], index: 4, kind: input, shape index: {}]   ;;  %s478_s5 = inlined_call_operand.hbm [shape: f32[8,128], index: 5, kind: output, shape index: {}]  }
   0x1   :  { %11 = vsyncpa [#allocation6], 0 }
   0x2   :  { %12 = vsyncpa [#allocation4], 0  ;;  %s416_s18 = smov [#allocation5]  }
   0x3   :  { %s28_s19 = sshll.u32 %s416_s18, 4  ;;  %s29_s19 = int_to_ptr.vmem [resolvable:$true] %s28_s19 }
   0x4   :  { %s338_s20 = scalar_lea.vmem %s29_s19, 1024  ;;  %p343_p1 = scmp.lt.s32.totalorder %s29_s19, %s29_s19 }
   0x5   :  { %p339_p0 = scmp.ne.s32.totalorder %s29_s19, %s338_s20  ;;  %p344_p2 = scmp.lt.s32.totalorder %s338_s20, %s338_s20 }
   0x7   :  { %p345_p3 = por %p344_p2, %p343_p1 }
   0x9   :  { %p346_p4 = pnand %p345_p3, %p339_p0 }
   0xb   :  { %349 = shalt.err (!%p346_p4)
}
   0xc   :  { %s417_s21 = smov 256   ;;  %s418_s22 = smov 16  }
   0xd   :  { %34 = dma.hbm_to_vmem [thread:$0]  %s474_s1, 1024, %s29_s19, [#allocation6], %s417_s21, %s417_s21, %s418_s22  }
   0xe   :  { %s419_s25 = smov [#allocation2]   ;;  %s420_s27 = smov [#allocation7]  }
   0xf   :  { %s19_s26 = sshll.u32 %s419_s25, 4  ;;  %s42_s28 = sshll.u32 %s420_s27, 4  ;;  %s20_s26 = int_to_ptr.vmem [resolvable:$true] %s19_s26  ;;  %s43_s28 = int_to_ptr.vmem [resolvable:$true] %s42_s28 }
  0x10   :  { %s358_s29 = scalar_lea.vmem %s20_s26, 128  ;;  %p363_p6 = scmp.lt.s32.totalorder %s20_s26, %s20_s26 }
  0x11   :  { %p359_p5 = scmp.ne.s32.totalorder %s20_s26, %s358_s29  ;;  %p364_p7 = scmp.lt.s32.totalorder %s358_s29, %s358_s29 }
  0x13   :  { %p365_p8 = por %p364_p7, %p363_p6 }
  0x15   :  { %p366_p9 = pnand %p365_p8, %p359_p5 }
  0x17   :  { %369 = shalt.err (!%p366_p9)
}
  0x18   :  { %22 = dma.hbm_to_vmem [thread:$0]  %s473_s0, 128, %s20_s26, [#allocation3]  }
  0x19   :  { %s378_s7 = scalar_lea.vmem %s43_s28, 4096  ;;  %p383_p11 = scmp.lt.s32.totalorder %s43_s28, %s43_s28 }
  0x1a   :  { %p379_p10 = scmp.ne.s32.totalorder %s43_s28, %s378_s7  ;;  %p384_p12 = scmp.lt.s32.totalorder %s378_s7, %s378_s7 }
  0x1c   :  { %p385_p13 = por %p384_p12, %p383_p11 }
  0x1e   :  { %p386_p0 = pnand %p385_p13, %p379_p10 }
  0x20   :  { %389 = shalt.err (!%p386_p0)
}
  0x21   :  { %s421_s1 = smov 128   ;;  %s422_s8 = smov 8  }
  0x22   :  { %48 = dma.hbm_to_vmem [thread:$0]  %s476_s3, 4096, %s43_s28, [#allocation6], %s421_s1, %s421_s1, %s422_s8  }
  0x23   :  { %410 = dma.done.wait [#allocation3], 128  }
  0x24   :  { %411 = vsyncadd [#allocation3], 4294967168 }
  0x25   :  { %412 = dma.done.wait [#allocation6], 5120  }
  0x26   :  { %413 = vsyncadd [#allocation6], 4294962176  ;;  %v423_v0 = vmov 0.0   ;;  %v68_v1 = vld [vmem:[#allocation5 + $0x38] sm:$0xff]  ;;  %v67_v2 = vld [vmem:[#allocation5 + $0x30] sm:$0xff]  ;;  %vm81_vm0 = vcmask 261120   ;;  %v71_v42 = vlaneseq }
  0x27   :  { %149 = vmatprep.mubr.f32.mxu0 %v423_v0  ;;  %v66_v3 = vld [vmem:[#allocation5 + $0x28] sm:$0xff]  ;;  %109 = vmatprep.subr.mxu0 %v68_v1  ;;  %v65_v4 = vld [vmem:[#allocation5 + $0x20] sm:$0xff]  ;;  %v64_v5 = vld [vmem:[#allocation5 + $0x18] sm:$0xff]  ;;  %s424_s13 = smov [#allocation8]  }
  0x28   :  { %110 = vmatpush1.msra.mxu0 %v67_v2  ;;  %v63_v6 = vld [vmem:[#allocation5 + $0x10] sm:$0xff]  ;;  %v189_v7 = vld [vmem:[#allocation7 + $0xf8] sm:$0xff]  ;;  %v62_v10 = vld [vmem:[#allocation5 + $0x8] sm:$0xff]  ;;  %v72_v43 = vshrl.u32 %v71_v42, 7  ;;  %s274_s14 = sshll.u32 %s424_s13, 4  ;;  %s275_s14 = int_to_ptr.vmem [resolvable:$true] %s274_s14 }
  0x29   :  { %111 = vmatprep.subr.mxu0 %v66_v3  ;;  %v173_v8 = vld [vmem:[#allocation7 + $0x78] sm:$0xff]  ;;  %v188_v9 = vld [vmem:[#allocation7 + $0xf0] sm:$0xff]  ;;  %286 = vmatprep.subr.mxu1 %v189_v7  ;;  %v61_v12 = vld [vmem:[#allocation5] sm:$0xff]  ;;  %p395_p2 = scmp.lt.s32.totalorder %s275_s14, %s275_s14 }
  0x2a   :  { %112 = vmatpush1.msra.mxu0 %v65_v4  ;;  %v172_v11 = vld [vmem:[#allocation7 + $0x70] sm:$0xff]  ;;  %287 = vmatpush3.msra.mxu1 %v173_v8  ;;  %v187_v13 = vld [vmem:[#allocation7 + $0xe8] sm:$0xff]  ;;  %v60_v14 = vld [vmem:[#allocation2] sm:$0xff]  ;;  %v73_v44 = vsub.s32 0, %v72_v43  ;;  %v77_v46 = vsub.s32 1, %v72_v43 }
  0x2b   :  { %113 = vmatprep.subr.mxu0 %v64_v5  ;;  %288 = vmatprep.subr.mxu1 %v188_v9  ;;  %v171_v15 = vld [vmem:[#allocation7 + $0x68] sm:$0xff]  ;;  %v186_v16 = vld [vmem:[#allocation7 + $0xe0] sm:$0xff]  ;;  %v185_v18 = vld [vmem:[#allocation7 + $0xd8] sm:$0xff] }
  0x2c   :  { %114 = vmatpush1.msra.mxu0 %v63_v6  ;;  %289 = vmatpush3.msra.mxu1 %v172_v11  ;;  %v170_v17 = vld [vmem:[#allocation7 + $0x60] sm:$0xff]  ;;  %v169_v19 = vld [vmem:[#allocation7 + $0x58] sm:$0xff]  ;;  %v184_v20 = vld [vmem:[#allocation7 + $0xd0] sm:$0xff] }
  0x2d   :  { %115 = vmatprep.subr.mxu0 %v62_v10  ;;  %290 = vmatprep.subr.mxu1 %v187_v13  ;;  %v168_v21 = vld [vmem:[#allocation7 + $0x50] sm:$0xff]  ;;  %v183_v22 = vld [vmem:[#allocation7 + $0xc8] sm:$0xff]  ;;  %v182_v24 = vld [vmem:[#allocation7 + $0xc0] sm:$0xff] }
  0x2e   :  { %116 = vmatpush1.msra.mxu0 %v61_v12  ;;  %291 = vmatpush3.msra.mxu1 %v171_v15  ;;  %v167_v23 = vld [vmem:[#allocation7 + $0x48] sm:$0xff]  ;;  %v166_v25 = vld [vmem:[#allocation7 + $0x40] sm:$0xff]  ;;  %v181_v26 = vld [vmem:[#allocation7 + $0xb8] sm:$0xff] }
  0x2f   :  { %284 = vmatmul.mubr.msk.f32.vlgmr.msra.gmra.mxu0 %vm81_vm0, %v60_v14  ;;  %292 = vmatprep.subr.mxu1 %v186_v16  ;;  %v165_v27 = vld [vmem:[#allocation7 + $0x38] sm:$0xff]  ;;  %v180_v28 = vld [vmem:[#allocation7 + $0xb0] sm:$0xff]  ;;  %v179_v30 = vld [vmem:[#allocation7 + $0xa8] sm:$0xff] }
  0x30   :  { %293 = vmatpush3.msra.mxu1 %v170_v17  ;;  %v164_v29 = vld [vmem:[#allocation7 + $0x30] sm:$0xff]  ;;  %v163_v31 = vld [vmem:[#allocation7 + $0x28] sm:$0xff]  ;;  %v178_v32 = vld [vmem:[#allocation7 + $0xa0] sm:$0xff] }
  0x31   :  { %294 = vmatprep.subr.mxu1 %v185_v18  ;;  %v162_v33 = vld [vmem:[#allocation7 + $0x20] sm:$0xff]  ;;  %v177_v34 = vld [vmem:[#allocation7 + $0x98] sm:$0xff]  ;;  %v176_v36 = vld [vmem:[#allocation7 + $0x90] sm:$0xff] }
  0x32   :  { %295 = vmatpush3.msra.mxu1 %v169_v19  ;;  %v161_v35 = vld [vmem:[#allocation7 + $0x18] sm:$0xff]  ;;  %v160_v37 = vld [vmem:[#allocation7 + $0x10] sm:$0xff]  ;;  %v175_v38 = vld [vmem:[#allocation7 + $0x88] sm:$0xff] }
  0x33   :  { %296 = vmatprep.subr.mxu1 %v184_v20  ;;  %v159_v39 = vld [vmem:[#allocation7 + $0x8] sm:$0xff]  ;;  %v174_v40 = vld [vmem:[#allocation7 + $0x80] sm:$0xff]  ;;  %v69_v45 = vld [vmem:[%s475_s2] sm:$0x3]  ;;  %s390_s2 = scalar_lea.vmem %s275_s14, 128 }
  0x34   :  { %297 = vmatpush3.msra.mxu1 %v168_v21  ;;  %v158_v41 = vld [vmem:[#allocation7] sm:$0xff]  ;;  %v74_v47 = vrot.slane %v69_v45, %v73_v44  ;;  %v78_v48 = vrot.slane %v69_v45, %v77_v46  ;;  %v285_v56 = vld [vmem:[%s477_s4] ss:$0 sm:$0xff]  ;;  %p391_p1 = scmp.ne.s32.totalorder %s275_s14, %s390_s2  ;;  %p396_p3 = scmp.lt.s32.totalorder %s390_s2, %s390_s2 }
  0x35   :  { %298 = vmatprep.subr.mxu1 %v183_v22 }
  0x36   :  { %299 = vmatpush3.msra.mxu1 %v167_v23  ;;  %p397_p4 = por %p396_p3, %p395_p2 }
  0x37   :  { %300 = vmatprep.subr.mxu1 %v182_v24 }
  0x38   :  { %301 = vmatpush3.msra.mxu1 %v166_v25  ;;  %p398_p5 = pnand %p397_p4, %p391_p1 }
  0x39   :  { %302 = vmatprep.subr.mxu1 %v181_v26 }
  0x3a   :  { %303 = vmatpush3.msra.mxu1 %v165_v27 }
  0x3b   :  { %304 = vmatprep.subr.mxu1 %v180_v28 }
  0x3c   :  { %305 = vmatpush3.msra.mxu1 %v164_v29 }
  0x3d   :  { %306 = vmatprep.subr.mxu1 %v179_v30 }
  0x3e   :  { %307 = vmatpush3.msra.mxu1 %v163_v31 }
  0x3f   :  { %308 = vmatprep.subr.mxu1 %v178_v32 }
  0x40   :  { %309 = vmatpush3.msra.mxu1 %v162_v33 }
  0x41   :  { %310 = vmatprep.subr.mxu1 %v177_v34 }
  0x42   :  { %311 = vmatpush3.msra.mxu1 %v161_v35 }
  0x43   :  { %312 = vmatprep.subr.mxu1 %v176_v36 }
  0x44   :  { %313 = vmatpush3.msra.mxu1 %v160_v37 }
  0x45   :  { %314 = vmatprep.subr.mxu1 %v175_v38 }
  0x46   :  { %315 = vmatpush3.msra.mxu1 %v159_v39 }
  0x47   :  { %316 = vmatprep.subr.mxu1 %v174_v40 }
  0x48   :  { %317 = vmatpush3.msra.mxu1 %v158_v41 }
  0xef   :  { %v151_v49 = vpop.f32.mrf.mxu0 }
  0xf0   :  { %v152_v50 = vadd.f32 %v151_v49, %v74_v47 }
  0xf1   :  { %v153_v51 = vpop.f32.mrf.mxu0 }
  0xf2   :  { %v154_v52 = vadd.f32 %v153_v51, %v78_v48  ;;  %v156_v54 = vmax.f32 %v152_v50, 0.0 }
  0xf4   :  { %v157_v53 = vmax.f32 %v154_v52, 0.0 }
  0xf6   :  { %261 = vmatprep.mubr.f32.mxu1 %v157_v53 }
  0xf7   :  { %262 = vmatmul.mubr.f32.vlgmr.msra.gmra.mxu1 %v156_v54 }
 0x1b7   :  { %v318_v55 = vpop.f32.mrf.mxu1 }
 0x1b9   :  { %v319_v57 = vpop.f32.mrf.mxu1 }
 0x1ba   :  { %v320_v58 = vadd.f32 %v319_v57, %v318_v55 }
 0x1bc   :  { %v264_v59 = vadd.f32 %v320_v58, %v285_v56 }
 0x1be   :  { %267 = vst [vmem:[#allocation8] sm:$0xff] %v264_v59 }
 0x1bf   :  { %401 = shalt.err (!%p398_p5)
}
 0x1c0   :  { %277 = dma.vmem_to_hbm [thread:$0]  %s275_s14, 128, %s478_s5, [#allocation4]  }
 0x1c1   :  { %414 = dma.done.wait [#allocation4], 128  }
 0x1c2   :  { %415 = vsyncadd [#allocation4], 4294967168 }
 0x1c3   :  { %281 = vsyncpa [#allocation3], 1 }
 0x1c4   :  { %282 = vsyncpa [#allocation6], 1 }
 0x1c5   :  { %283 = vsyncpa [#allocation4], 1 }

</bundles_post_ra>
